<compile_context>
chip_gen: v7x
topology: tpu7x:2x2x1
jax: 0.10.0
libtpu: 0.0.40
codegen_flags: <defaults>
</compile_context>

<pallas_src>
import functools
import math

import jax
import jax.numpy as jnp
from jax.experimental import pallas as pl
from jax.experimental.pallas import tpu as pltpu


def _round_up(x, m):
    return (x + m - 1) // m * m


def _online_update(logits, m_ref, l_ref):
    """Flash-style running max / running sum-exp update (f32)."""
    m_prev = m_ref[...]
    m_new = jnp.maximum(m_prev, jnp.max(logits, axis=-1, keepdims=True))
    l_ref[...] = (
        l_ref[...] * jnp.exp(m_prev - m_new)
        + jnp.sum(jnp.exp(logits - m_new), axis=-1, keepdims=True)
    )
    m_ref[...] = m_new


def _generator_kernel_cached(x_ref, w_ref, b_ref, o_ref,
                             m_ref, l_ref, cache_ref, *, num_v):
    # x_ref: (tile_m, d_model) bf16     w_ref: (d_model, tile_n) bf16
    # b_ref: (1, tile_n) f32            o_ref: (tile_m, tile_n)
    # m_ref/l_ref: (tile_m, 1) f32 running stats
    # cache_ref: (num_v, tile_m, tile_n) cached pass-1 logits
    j = pl.program_id(1)

    @pl.when(j == 0)
    def _init():
        m_ref[...] = jnp.full_like(m_ref, -jnp.inf)
        l_ref[...] = jnp.zeros_like(l_ref)

    @pl.when(j < num_v)
    def _pass1():
        logits = (
            jnp.dot(x_ref[...], w_ref[...], preferred_element_type=jnp.float32)
            + b_ref[...]
        )
        cache_ref[j] = logits.astype(cache_ref.dtype)
        _online_update(logits, m_ref, l_ref)

    @pl.when(j >= num_v)
    def _pass2():
        # NOTE: the output block for this row tile is resident (same block
        # index) throughout pass 1 and is only written here; this relies on
        # Pallas writing an output block back only when its block index
        # changes (standard accumulator semantics).
        lse = m_ref[...] + jnp.log(l_ref[...])
        logits = cache_ref[jnp.maximum(j - num_v, 0)].astype(jnp.float32)
        o_ref[...] = (logits - lse).astype(o_ref.dtype)


def _generator_kernel_recompute(x_ref, w_ref, b_ref, o_ref, m_ref, l_ref, *, num_v):
    # Fallback for vocab sizes where the logits cache does not fit VMEM.
    # Pass 2 recomputes each slab; the wrapper's index_maps walk pass 2 in
    # reverse vocab order so the last pass-1 weight slab is reused.
    j = pl.program_id(1)

    @pl.when(j == 0)
    def _init():
        m_ref[...] = jnp.full_like(m_ref, -jnp.inf)
        l_ref[...] = jnp.zeros_like(l_ref)

    logits = (
        jnp.dot(x_ref[...], w_ref[...], preferred_element_type=jnp.float32)
        + b_ref[...]
    )

    @pl.when(j < num_v)
    def _pass1():
        _online_update(logits, m_ref, l_ref)

    @pl.when(j >= num_v)
    def _pass2():
        lse = m_ref[...] + jnp.log(l_ref[...])
        o_ref[...] = (logits - lse).astype(o_ref.dtype)


def prepare_generator_params(weight, bias):
    """One-time prep: bf16 cast + pad vocab to a multiple of 128.

    weight: (d_model, vocab) (PyTorch nn.Linear weight transposed)
    bias:   (vocab,)
    Returns (w_bf16 (d_model, v_pad), b_f32 (1, v_pad)).
    """
    d_model, vocab = weight.shape
    v_pad = _round_up(vocab, 128)
    w = weight.astype(jnp.bfloat16)
    b = bias.astype(jnp.float32).reshape(1, vocab)
    if v_pad != vocab:
        w = jnp.pad(w, ((0, 0), (0, v_pad - vocab)))
        # Huge negative bias on padded columns -> they vanish from the softmax.
        b = jnp.pad(b, ((0, 0), (0, v_pad - vocab)), constant_values=-1e30)
    return w, b


def generator_forward(x, w, b, vocab, *, tile_m=512, tile_n=1024,
                      out_dtype=jnp.float32):
    """log_softmax(x @ w[:, :vocab] + b[:, :vocab], axis=-1).

    x: (..., d_model); w/b: outputs of prepare_generator_params.
    """
    orig_shape = x.shape
    d_model = orig_shape[-1]
    v_pad = w.shape[1]
    N = math.prod(orig_shape[:-1]) if len(orig_shape) > 1 else 1

    x2d = x.reshape(N, d_model).astype(jnp.bfloat16)
    out_isz = jnp.dtype(out_dtype).itemsize

    # --- vocab tiling: multiple of 128 that divides v_pad (lane-dense) ---
    tile_n = max(128, min(tile_n, v_pad))
    tile_n = (tile_n // 128) * 128
    while v_pad % tile_n != 0:
        tile_n -= 128
    num_v = v_pad // tile_n

    # --- row tiling + logits-cache sizing ---
    tile_m = max(16, min(tile_m, _round_up(N, 16)))
    tile_m = _round_up(tile_m, 16)           # bf16 sublane packing
    if tile_m >= 128:
        tile_m = _round_up(tile_m, 128)      # MXU-friendly

    CACHE_BUDGET = 40 << 20                  # headroom under v7x's 64 MiB VMEM

    def _budget(tm):
        pipe = (2 * tm * d_model * 2         # x tiles (bf16, double-buffered)
                + 2 * d_model * tile_n * 2   # weight slabs (bf16)
                + 2 * 8 * tile_n * 4         # bias slabs (sublane-padded f32)
                + 2 * tm * tile_n * out_isz  # output tiles
                + 4 * tm * 4)                # m/l scratch
        c32 = num_v * tm * tile_n * 4
        if pipe + c32 <= CACHE_BUDGET:
            return pipe, c32, jnp.float32, True
        if pipe + c32 // 2 <= CACHE_BUDGET:
            return pipe, c32 // 2, jnp.bfloat16, True
        return pipe, 0, None, False

    pipe_bytes, cache_bytes, cache_dtype, use_cache = _budget(tile_m)
    # Prefer shrinking tile_m over giving up the logits cache.
    while not use_cache and tile_m > 128:
        tile_m = max(128, tile_m // 2)
        pipe_bytes, cache_bytes, cache_dtype, use_cache = _budget(tile_m)

    n_pad = _round_up(N, tile_m)
    if n_pad != N:
        x2d = jnp.pad(x2d, ((0, n_pad - N), (0, 0)))
    num_m = n_pad // tile_m

    need = pipe_bytes + (cache_bytes if use_cache else 0)
    vmem_limit = int(min(max(need + (8 << 20), 32 << 20), 48 << 20))

    scratch = [pltpu.VMEM((tile_m, 1), jnp.float32),   # running max
               pltpu.VMEM((tile_m, 1), jnp.float32)]   # running sum-exp

    if use_cache:
        kernel = functools.partial(_generator_kernel_cached, num_v=num_v)
        # Hold the weight/bias block index constant during pass 2 -> each
        # weight slab is DMA'd from HBM exactly once per row tile.
        w_map = lambda i, j: (0, jnp.minimum(j, num_v - 1))
        b_map = lambda i, j: (0, jnp.minimum(j, num_v - 1))
        o_map = lambda i, j: (i, jnp.maximum(j - num_v, 0))
        scratch = scratch + [pltpu.VMEM((num_v, tile_m, tile_n), cache_dtype)]
    else:
        kernel = functools.partial(_generator_kernel_recompute, num_v=num_v)
        # Pass 2 walks vocab slabs in reverse so the last pass-1 slab is reused.
        w_map = lambda i, j: (0, jnp.where(j < num_v, j, 2 * num_v - 1 - j))
        b_map = lambda i, j: (0, jnp.where(j < num_v, j, 2 * num_v - 1 - j))
        o_map = lambda i, j: (i, jnp.where(j < num_v, num_v - 1, 2 * num_v - 1 - j))

    out2d = pl.pallas_call(
        kernel,
        out_shape=jax.ShapeDtypeStruct((n_pad, v_pad), out_dtype),
        grid_spec=pltpu.PrefetchScalarGridSpec(
            num_scalar_prefetch=0,
            # Inner axis: num_v stat steps (pass 1) + num_v write steps (pass 2).
            grid=(num_m, 2 * num_v),
            in_specs=[
                pl.BlockSpec((tile_m, d_model), lambda i, j: (i, 0)),
                pl.BlockSpec((d_model, tile_n), w_map),
                pl.BlockSpec((1, tile_n), b_map),
            ],
            out_specs=pl.BlockSpec((tile_m, tile_n), o_map),
            scratch_shapes=scratch,
        ),
        compiler_params=pltpu.CompilerParams(
            dimension_semantics=("parallel", "arbitrary"),
            vmem_limit_bytes=vmem_limit,
        ),
    )(x2d, w, b)

    if n_pad != N or v_pad != vocab:
        out2d = out2d[:N, :vocab]
    return out2d.reshape(*orig_shape[:-1], vocab)


class Generator:
    """Mirrors the PyTorch module: prep (cast/pad) once, fast forward per call."""

    def __init__(self, weight, bias):
        # weight: (d_model, vocab) = transpose of PyTorch nn.Linear weight.
        self.vocab = weight.shape[1]
        self.w, self.b = prepare_generator_params(weight, bias)

    def __call__(self, x, **kwargs):
        return generator_forward(x, self.w, self.b, self.vocab, **kwargs)


if __name__ == "__main__":
    # Small shapes consistent with the module: d_model=32, vocab=128, B=2, S=8.
    B, S, d_model, vocab = 2, 8, 32, 128

    key = jax.random.PRNGKey(0)
    kx, kw, kb = jax.random.split(key, 3)

    x = jax.random.normal(kx, (B, S, d_model), dtype=jnp.float32)

    # Deterministic synthetic parameters for nn.Linear(d_model, vocab)
    # (PyTorch weight is (vocab, d_model); we store its transpose).
    bound = 1.0 / math.sqrt(d_model)
    weight = jax.random.uniform(
        kw, (d_model, vocab), minval=-bound, maxval=bound, dtype=jnp.float32
    )
    bias = jax.random.uniform(
        kb, (vocab,), minval=-bound, maxval=bound, dtype=jnp.float32
    )

    gen = Generator(weight, bias)          # one-time weight cast/pad
    out = jax.block_until_ready(gen(x))

    # Reference in f32 (kernel uses bf16 MXU operands -> loose tolerance).
    ref = jax.nn.log_softmax(x @ weight + bias, axis=-1)
    assert out.shape == (B, S, vocab)
    assert jnp.allclose(out, ref, atol=5e-2, rtol=5e-2)
    # log-softmax invariant: each row exponentiates to a probability dist.
    assert jnp.allclose(jnp.sum(jnp.exp(out), axis=-1), 1.0, atol=1e-3)

    print("KERNEL_OK")
</pallas_src>

<mosaic_0001>
module attributes {stable_mosaic.version = 11 : i64} {
  func.func @_generator_kernel_cached(%arg0: i32, %arg1: i32, %arg2: memref<16x32xbf16, #tpu.memory_space<vmem>>, %arg3: memref<32x128xbf16, #tpu.memory_space<vmem>>, %arg4: memref<1x128xf32, #tpu.memory_space<vmem>>, %arg5: memref<16x128xf32, #tpu.memory_space<vmem>>, %arg6: memref<16x1xf32, #tpu.memory_space<vmem>>, %arg7: memref<16x1xf32, #tpu.memory_space<vmem>>, %arg8: memref<1x16x128xf32, #tpu.memory_space<vmem>>) attributes {dimension_semantics = [#tpu.dimension_semantics<parallel>, #tpu.dimension_semantics<arbitrary>], iteration_bounds = array<i64: 1, 2>, scalar_prefetch = 0 : i64, scratch_operands = 3 : i64, tpu.core_type = #tpu.core_type<tc>, window_params = [{transform_indices = @transform_0, window_bounds = array<i64: 16, 32>}, {transform_indices = @transform_1, window_bounds = array<i64: 32, 128>}, {transform_indices = @transform_2, window_bounds = array<i64: 1, 128>}, {transform_indices = @transform_3, window_bounds = array<i64: 16, 128>}]} {
    %c0_i32 = arith.constant 0 : i32
    %0 = arith.cmpi eq, %arg1, %c0_i32 : i32
    %1 = arith.extui %0 : i1 to i32
    %c0_i32_0 = arith.constant 0 : i32
    %2 = arith.cmpi ne, %1, %c0_i32_0 : i32
    scf.if %2 {
      %cst = arith.constant 0xFF800000 : f32
      %9 = vector.broadcast %cst : f32 to vector<16x1xf32>
      %c0 = arith.constant 0 : index
      %c0_4 = arith.constant 0 : index
      %10 = vector.load %arg6[%c0, %c0_4] : memref<16x1xf32, #tpu.memory_space<vmem>>, vector<16x1xf32>
      tpu.vector_store %arg6[%c0, %c0_4], %9 {strides = array<i32>} : memref<16x1xf32, #tpu.memory_space<vmem>>, vector<16x1xf32>,
      %cst_5 = arith.constant 0.000000e+00 : f32
      %11 = vector.broadcast %cst_5 : f32 to vector<16x1xf32>
      %c0_6 = arith.constant 0 : index
      %c0_7 = arith.constant 0 : index
      %12 = vector.load %arg7[%c0_6, %c0_7] : memref<16x1xf32, #tpu.memory_space<vmem>>, vector<16x1xf32>
      tpu.vector_store %arg7[%c0_6, %c0_7], %11 {strides = array<i32>} : memref<16x1xf32, #tpu.memory_space<vmem>>, vector<16x1xf32>,
    } else {
    }
    %c1_i32 = arith.constant 1 : i32
    %3 = arith.cmpi slt, %arg1, %c1_i32 : i32
    %4 = arith.extui %3 : i1 to i32
    %c0_i32_1 = arith.constant 0 : i32
    %5 = arith.cmpi ne, %4, %c0_i32_1 : i32
    scf.if %5 {
      %c0 = arith.constant 0 : index
      %c0_4 = arith.constant 0 : index
      %9 = vector.load %arg2[%c0, %c0_4] : memref<16x32xbf16, #tpu.memory_space<vmem>>, vector<16x32xbf16>
      %c0_5 = arith.constant 0 : index
      %c0_6 = arith.constant 0 : index
      %10 = vector.load %arg3[%c0_5, %c0_6] : memref<32x128xbf16, #tpu.memory_space<vmem>>, vector<32x128xbf16>
      %cst = arith.constant dense<0.000000e+00> : vector<16x128xf32>
      %11 = tpu.matmul %9, %10, %cst {dimension_numbers = #tpu.dot_dimension_numbers<[1], [0], [0], [1], [0, 0, 1, 1], [], []>} : vector<16x32xbf16>, vector<32x128xbf16>, vector<16x128xf32> -> vector<16x128xf32>
      %c0_7 = arith.constant 0 : index
      %c0_8 = arith.constant 0 : index
      %12 = vector.load %arg4[%c0_7, %c0_8] : memref<1x128xf32, #tpu.memory_space<vmem>>, vector<1x128xf32>
      %13 = vector.broadcast %12 : vector<1x128xf32> to vector<16x128xf32>
      %14 = arith.addf %11, %13 : vector<16x128xf32>
      %15 = arith.index_cast %arg1 : i32 to index
      %c0_9 = arith.constant 0 : index
      %c0_10 = arith.constant 0 : index
      %16 = vector.load %arg8[%15, %c0_9, %c0_10] : memref<1x16x128xf32, #tpu.memory_space<vmem>>, vector<1x16x128xf32>
      %17 = vector.shape_cast %16 : vector<1x16x128xf32> to vector<16x128xf32>
      %18 = vector.shape_cast %14 : vector<16x128xf32> to vector<1x16x128xf32>
      tpu.vector_store %arg8[%15, %c0_9, %c0_10], %18 {strides = array<i32>} : memref<1x16x128xf32, #tpu.memory_space<vmem>>, vector<1x16x128xf32>,
      %c0_11 = arith.constant 0 : index
      %c0_12 = arith.constant 0 : index
      %19 = vector.load %arg6[%c0_11, %c0_12] : memref<16x1xf32, #tpu.memory_space<vmem>>, vector<16x1xf32>
      %cst_13 = arith.constant dense<0xFF800000> : vector<16xf32>
      %20 = vector.multi_reduction <maximumf>, %14, %cst_13 [1] : vector<16x128xf32> to vector<16xf32>
      %21 = vector.shape_cast %20 : vector<16xf32> to vector<16x1xf32>
      %22 = arith.maximumf %19, %21 : vector<16x1xf32>
      %c0_14 = arith.constant 0 : index
      %c0_15 = arith.constant 0 : index
      %23 = vector.load %arg7[%c0_14, %c0_15] : memref<16x1xf32, #tpu.memory_space<vmem>>, vector<16x1xf32>
      %24 = arith.subf %19, %22 : vector<16x1xf32>
      %25 = math.exp %24 : vector<16x1xf32>
      %26 = arith.mulf %23, %25 : vector<16x1xf32>
      %27 = vector.broadcast %22 : vector<16x1xf32> to vector<16x128xf32>
      %28 = arith.subf %14, %27 : vector<16x128xf32>
      %29 = math.exp %28 : vector<16x128xf32>
      %cst_16 = arith.constant dense<0.000000e+00> : vector<16xf32>
      %30 = vector.multi_reduction <add>, %29, %cst_16 [1] : vector<16x128xf32> to vector<16xf32>
      %31 = vector.shape_cast %30 : vector<16xf32> to vector<16x1xf32>
      %32 = arith.addf %26, %31 : vector<16x1xf32>
      %c0_17 = arith.constant 0 : index
      %c0_18 = arith.constant 0 : index
      %33 = vector.load %arg7[%c0_17, %c0_18] : memref<16x1xf32, #tpu.memory_space<vmem>>, vector<16x1xf32>
      tpu.vector_store %arg7[%c0_17, %c0_18], %32 {strides = array<i32>} : memref<16x1xf32, #tpu.memory_space<vmem>>, vector<16x1xf32>,
      %c0_19 = arith.constant 0 : index
      %c0_20 = arith.constant 0 : index
      %34 = vector.load %arg6[%c0_19, %c0_20] : memref<16x1xf32, #tpu.memory_space<vmem>>, vector<16x1xf32>
      tpu.vector_store %arg6[%c0_19, %c0_20], %22 {strides = array<i32>} : memref<16x1xf32, #tpu.memory_space<vmem>>, vector<16x1xf32>,
    } else {
    }
    %c1_i32_2 = arith.constant 1 : i32
    %6 = arith.cmpi sge, %arg1, %c1_i32_2 : i32
    %7 = arith.extui %6 : i1 to i32
    %c0_i32_3 = arith.constant 0 : i32
    %8 = arith.cmpi ne, %7, %c0_i32_3 : i32
    scf.if %8 {
      %c0 = arith.constant 0 : index
      %c0_4 = arith.constant 0 : index
      %9 = vector.load %arg6[%c0, %c0_4] : memref<16x1xf32, #tpu.memory_space<vmem>>, vector<16x1xf32>
      %c0_5 = arith.constant 0 : index
      %c0_6 = arith.constant 0 : index
      %10 = vector.load %arg7[%c0_5, %c0_6] : memref<16x1xf32, #tpu.memory_space<vmem>>, vector<16x1xf32>
      %11 = math.log %10 : vector<16x1xf32>
      %12 = arith.addf %9, %11 : vector<16x1xf32>
      %c1_i32_7 = arith.constant 1 : i32
      %13 = arith.subi %arg1, %c1_i32_7 : i32
      %c0_i32_8 = arith.constant 0 : i32
      %14 = arith.maxsi %13, %c0_i32_8 : i32
      %15 = arith.index_cast %14 : i32 to index
      %c0_9 = arith.constant 0 : index
      %c0_10 = arith.constant 0 : index
      %16 = vector.load %arg8[%15, %c0_9, %c0_10] : memref<1x16x128xf32, #tpu.memory_space<vmem>>, vector<1x16x128xf32>
      %17 = vector.shape_cast %16 : vector<1x16x128xf32> to vector<16x128xf32>
      %18 = vector.broadcast %12 : vector<16x1xf32> to vector<16x128xf32>
      %19 = arith.subf %17, %18 : vector<16x128xf32>
      %c0_11 = arith.constant 0 : index
      %c0_12 = arith.constant 0 : index
      %20 = vector.load %arg5[%c0_11, %c0_12] : memref<16x128xf32, #tpu.memory_space<vmem>>, vector<16x128xf32>
      tpu.vector_store %arg5[%c0_11, %c0_12], %19 {strides = array<i32>} : memref<16x128xf32, #tpu.memory_space<vmem>>, vector<16x128xf32>,
    } else {
    }
    return
  }
  func.func @transform_0(%arg0: i32, %arg1: i32) -> (i32, i32) {
    %c0_i32 = arith.constant 0 : i32
    %c0_i32_0 = arith.constant 0 : i32
    return %arg0, %c0_i32 : i32, i32
  }
  func.func @transform_1(%arg0: i32, %arg1: i32) -> (i32, i32) {
    %c0_i32 = arith.constant 0 : i32
    %0 = arith.minsi %arg1, %c0_i32 : i32
    %c0_i32_0 = arith.constant 0 : i32
    %c0_i32_1 = arith.constant 0 : i32
    return %c0_i32_0, %0 : i32, i32
  }
  func.func @transform_2(%arg0: i32, %arg1: i32) -> (i32, i32) {
    %c0_i32 = arith.constant 0 : i32
    %0 = arith.minsi %arg1, %c0_i32 : i32
    %c0_i32_0 = arith.constant 0 : i32
    %c0_i32_1 = arith.constant 0 : i32
    return %c0_i32_0, %0 : i32, i32
  }
  func.func @transform_3(%arg0: i32, %arg1: i32) -> (i32, i32) {
    %c1_i32 = arith.constant 1 : i32
    %0 = arith.subi %arg1, %c1_i32 : i32
    %c0_i32 = arith.constant 0 : i32
    %1 = arith.maxsi %0, %c0_i32 : i32
    %c0_i32_0 = arith.constant 0 : i32
    return %arg0, %1 : i32, i32
  }
}

</mosaic_0001>

<bundles_post_ra>
// kernel: tpu_custom_call.1
= control target key start
LH: loop header
LB: loop body
LE: loop exit
PB: predicated region body
PF: predicated region fallthrough
CT: control target
= control target key end

     0   :  { %8 = vsyncpa [#allocation6], 0  ;;  %s1149_s0 = inlined_call_operand.hbm [shape: bf16[16,32], index: 0, kind: input, shape index: {}]   ;;  %s1150_s1 = inlined_call_operand.hbm [shape: bf16[32,128], index: 1, kind: input, shape index: {}]   ;;  %s1151_s2 = inlined_call_operand.vmem [shape: f32[1,128], index: 2, kind: input, shape index: {}]   ;;  %s1152_s3 = inlined_call_operand.hbm [shape: f32[16,128], index: 3, kind: output, shape index: {}]  }
   0x1   :  { %9 = vsyncpa [#allocation9], 0 }
   0x2   :  { %11 = vsyncpa [#allocation9 + $0x1], 0 }
   0x3   :  { %12 = vsyncpa [#allocation7], 0 }
   0x4   :  { %14 = vsyncpa [#allocation7 + $0x1], 0  ;;  %s938_s12 = smov 0   ;;  %s940_s13 = smov 0  }
   0x5   :  { %s942_s14 = smov 0   ;;  %s944_s15 = smov 0  }
   0x6   :  { %s946_s16 = smov 0   ;;  %s948_s17 = smov 0  }
   0x7   :  { %s950_s18 = smov 0  }
   0x8 LB: > { %s573_s19 = sadd.s32 4294967295, %s903_s18   ;;  %s574_s20 = sadd.s32 4294967294, %s903_s18   ;;  %s903_s18 = sphi %s950_s18, %s20_s18   ;;  %s899_s17 = sphi %s948_s17, %s1176_s17   ;;  %s895_s16 = sphi %s946_s16, %s1175_s16   ;;  %s891_s15 = sphi %s944_s15, %s1139_s15   ;;  %s887_s14 = sphi %s942_s14, %s1174_s14   ;;  %s883_s13 = sphi %s940_s13, %s1134_s13   ;;  %s879_s12 = sphi %s938_s12, %s1173_s12  }
   0x9   : > { %p82_p0 = scmp.ne.s32.totalorder %s891_s15, %s887_s14  ;;  %p974_p1 = scmp.eq.s32.totalorder %s573_s19, 0 }
   0xa   : > { %p875_p2 = scmp.ne.s32.totalorder %s883_s13, 0  ;;  %p144_p4 = scmp.eq.s32.totalorder %s573_s19, 1 }
   0xb   : > { %s1159_s21 = scalar_select %p974_p1, 1, 0 }
   0xc   : > { %p981_p3 = por %p974_p1, %p82_p0  ;;  %p149_p5 = scmp.ne.s32.totalorder %s883_s13, %s879_s12 }
   0xd   : > { %p150_p6 = scmp.eq.s32.totalorder %s574_s20, 1  ;;  %p987_p7 = por %p875_p2, %p144_p4 }
   0xe   : > { %s1160_s22 = scalar_select %p981_p3, 1, 0 }
   0xf   : > { %s1161_s23 = scalar_select %p987_p7, 1, 0 }
  0x10   : > { %p577_p8 = scmp.ge.s32.totalorder %s903_s18, 1  ;;  %p992_p9 = por %p150_p6, %p149_p5 }
  0x11   : > { %p157_p10 = scmp.lt.s32.totalorder %s903_s18, 3  ;;  %s905_s26 = smov [#allocation5]  }
  0x12   : > { %s1162_s24 = scalar_select %p992_p9, 1, 0 }
  0x13   : > { %p997_p11 = pnand %p577_p8, %p157_p10  ;;  %s172_s27 = sshll.u32 %s905_s26, 4  ;;  %s173_s27 = int_to_ptr.vmem [resolvable:$true] %s172_s27 }
  0x14   : > { %s29_s29 = sadd.s32 1, %s899_s17  ;;  %s741_s5 = scalar_lea.hbm %s1149_s0, 128 }
  0x15   : > { %s1163_s25 = scalar_select %p997_p11, 1, 0 }
  0x16   : > { %p624_p12 = pneg %p997_p11  ;;  %p742_p2 = scmp.ne.s32.totalorder %s1149_s0, %s741_s5 }
  0x17   : > { %p748_p8 = scmp.lt.u32.totalorder %s741_s5, %s1149_s0 }
  0x18   : > { %p1006_p0 = pnand %p624_p12, %p974_p1 }
  0x1a   : > { %p743_p4 = pneg %p1006_p0 }
  0x1c   : > { %p744_p5 = pnand %p743_p4, %p742_p2 }
  0x1e   : > { %p745_p6 = pneg %p744_p5 }
  0x20   : > { %p750_p10 = pnand %p748_p8, %p745_p6 }
  0x22   : > { %753 = shalt.err (!%p750_p10)
}
  0x23   : > { %s754_s10 = scalar_lea.vmem %s173_s27, 128  ;;  %p762_p7 = scmp.lt.s32.totalorder %s173_s27, %s173_s27 }
  0x24   : > { %p755_p12 = scmp.ne.s32.totalorder %s173_s27, %s754_s10  ;;  %p763_p3 = scmp.lt.s32.totalorder %s754_s10, %s754_s10 }
  0x26   : > { %p757_p13 = pnand %p755_p12, %p743_p4  ;;  %p764_p1 = por %p763_p3, %p762_p7 }
  0x28   : > { %p758_p9 = pneg %p757_p13 }
  0x2a   : > { %p765_p11 = pnand %p764_p1, %p758_p9 }
  0x2c   : > { %768 = shalt.err (!%p765_p11)
}
  0x2d   : > { %s906_s11 = smov 64   ;;  %s907_s14 = smov 4  }
  0x2e   : > { %627 = dma.hbm_to_vmem [thread:$0]  (!%p1006_p0), %s1149_s0, 128, %s173_s27, [#allocation6], %s906_s11, %s906_s11, %s907_s14  }
  0x2f   : > { %p30_p13 = scmp.ge.s32.totalorder %s29_s29, 2  ;;  %p876_p2 = scmp.ne.s32.totalorder %s891_s15, 0 }
  0x30   : > { %p77_p1 = scmp.eq.s32.totalorder %s903_s18, 0  ;;  %p637_p7 = scmp.lt.s32.totalorder %s903_s18, 2 }
  0x31   : > { %s1178_s29 = smov (%p30_p13, %s29_s29), 0  ;;  %s908_s26 = smov [#allocation8]  }
  0x32   : > { %p78_p3 = por %p876_p2, %p77_p1  ;;  %s198_s30 = sshll.u32 %s908_s26, 4  ;;  %s199_s30 = int_to_ptr.vmem [resolvable:$true] %s198_s30 }
  0x33   : > { %s769_s6 = scalar_lea.hbm %s1150_s1, 256 }
  0x34   : > { %p1035_p9 = pnand %p637_p7, %p78_p3  ;;  %p770_p11 = scmp.ne.s32.totalorder %s1150_s1, %s769_s6 }
  0x35   : > { %p776_p6 = scmp.lt.u32.totalorder %s769_s6, %s769_s6  ;;  %p778_p8 = scmp.lt.u32.totalorder %s769_s6, %s1150_s1 }
  0x36   : > { %s1165_s4 = scalar_select %p1035_p9, 1, 0 }
  0x37   : > { %p771_p0 = pneg %p1035_p9  ;;  %p779_p10 = por %p778_p8, %p776_p6 }
  0x39   : > { %p772_p4 = pnand %p771_p0, %p770_p11 }
  0x3b   : > { %p773_p5 = pneg %p772_p4 }
  0x3d   : > { %p780_p12 = pnand %p779_p10, %p773_p5 }
  0x3f   : > { %783 = shalt.err (!%p780_p12)
}
  0x40   : > { %s784_s10 = scalar_lea.vmem %s199_s30, 256  ;;  %s791_s19 = scalar_lea.vmem %s199_s30, 512 }
  0x41   : > { %p785_p13 = scmp.ne.s32.totalorder %s199_s30, %s784_s10  ;;  %p792_p3 = scmp.lt.s32.totalorder %s199_s30, %s199_s30 }
  0x42   : > { %p793_p7 = scmp.lt.s32.totalorder %s791_s19, %s784_s10 }
  0x43   : > { %p787_p2 = pnand %p785_p13, %p771_p0 }
  0x44   : > { %p794_p9 = por %p793_p7, %p792_p3 }
  0x45   : > { %p788_p1 = pneg %p787_p2 }
  0x47   : > { %p795_p11 = pnand %p794_p9, %p788_p1 }
  0x49   : > { %798 = shalt.err (!%p795_p11)
}
  0x4a   : > { %p1166_p4 = scmp.ne.s32.totalorder %s1165_s4, 0  ;;  %p1167_p5 = scmp.ne.s32.totalorder %s1163_s25, 0 }
  0x4b   : > { %p1168_p0 = scmp.ne.s32.totalorder (!%p1167_p5), %s1159_s21, 0 }
  0x4c   : > { %631 = dma.hbm_to_vmem [thread:$0]  (!%p1166_p4), %s1150_s1, 256, %s199_s30, [#allocation9], %s906_s11, %s906_s11, %s907_s14  }
  0x4d   : > { %220 = sbr.rel (%p1167_p5) target bundleno = 940 (0x3ac), region = 32 }
  0x54   : > { %864 = dma.done.wait (%p1168_p0), [#allocation6], 128  }
  0x55   : > { %866 = vsyncadd (%p1168_p0), [#allocation6], 4294967168  ;;  %s226_s28 = sand.u32 1, %s891_s15   ;;  %p1169_p9 = scmp.ne.s32.totalorder %s1160_s22, 0 }
  0x56   : > { %s584_s4 = sshll.u32 %s226_s28, 4  ;;  %s227_s5 = scalar_lea.sflag [#allocation9], %s226_s28 }
  0x57   : > { %s230_s6 = scalar_lea.vmem [#allocation8], %s584_s4 }
  0x58   : > { %868 = dma.done.wait (%p1169_p9), %s227_s5, 256  }
  0x59   : > { %870 = vsyncadd (%p1169_p9), %s227_s5, 4294967040  ;;  %s255_s25 = sand.u32 1, %s883_s13   ;;  %p261_p6 = scmp.lt.s32.totalorder %s895_s16, 0 }
  0x5a   : > { %s585_s21 = sshll.u32 %s255_s25, 4  ;;  %p589_p8 = scmp.ne.s32.totalorder %s895_s16, 0 }
  0x5b   : > { %s262_s11 = scalar_select %p261_p6, %s895_s16, 0 }
  0x5c   : > { %s1077_s7 = scalar_lea.vmem [#allocation10], %s585_s21  ;;  %276 = sbr.rel (%p589_p8) target bundleno = 99 (0x63), region = 44  ;;  %vm277_vm0 = vcmask (!%p589_p8), 7168   ;;  %v909_v0 = vmov (!%p589_p8), -inf   ;;  %v910_v1 = vmov (!%p589_p8), 0.0  }
  0x5d   : > { %s1180_s11 = smov (!%p261_p6, %s262_s11), 0  ;;  %278 = vst.msk [vmem:[#allocation2] sm:$0xff] (!%p589_p8), %vm277_vm0, %v909_v0  ;;  %279 = vst.msk [vmem:[#allocation2 + $0x8] sm:$0xff] (!%p589_p8), %vm277_vm0, %v909_v0 }
  0x5e   : > { %s265_s27 = scalar_lea.vmem %s1151_s2, %s1180_s11  ;;  %280 = vst.msk [vmem:[#allocation3] sm:$0xff] (!%p589_p8), %vm277_vm0, %v910_v1  ;;  %281 = vst.msk [vmem:[#allocation3 + $0x8] sm:$0xff] (!%p589_p8), %vm277_vm0, %v910_v1 }
  0x63 PF: > { %p590_p10 = scmp.ge.s32.totalorder %s895_s16, 1 }
  0x64   : > { %v725_v2 = vld [vmem:[%s230_s6] sm:$0xff] (!%p590_p10)   ;;  %v911_v3 = vmov (!%p590_p10), 0.0   ;;  %v726_v4 = vld [vmem:[%s230_s6 + $0x8] sm:$0xff] (!%p590_p10)   ;;  %vm912_vm1 = vmmov (!%p590_p10), 0   ;;  %vm316_vm2 = vcmask (!%p590_p10), 261120   ;;  %s596_s22 = sshll.u32 (!%p590_p10), %s895_s16, 4 }
  0x65   : > { %285 = sbr.rel (%p590_p10) target bundleno = 759 (0x2f7), region = 48  ;;  %608 = vmatprep.subr.bf16.mxu0 (!%p590_p10), %v911_v3  ;;  %612 = vmatprep.mubr.msk.bf16.mxu0 (!%p590_p10), %vm912_vm1, %v911_v3  ;;  %v727_v5 = vld [vmem:[#allocation5] sm:$0xff] (!%p590_p10)   ;;  %v591_v6 = vld [vmem:[%s265_s27] ss:$0 sm:$0xff] (!%p590_p10)  ;;  %s362_s8 = scalar_lea.vmem (!%p590_p10), [#allocation4], %s596_s22  ;;  %v913_v13 = vmov (!%p590_p10), 0  }
  0x66   : > { %609 = vmatpush3.bf16.msra.mxu0 (!%p590_p10), %v725_v2  ;;  %723 = vset.pattern.permute.xlu1 (!%p590_p10), %v913_v13  ;;  %v365_v14 = vld [vmem:[#allocation2] sm:$0xff] (!%p590_p10)  ;;  %vm405_vm3 = vcmask (!%p590_p10), 7168   ;;  %v366_v17 = vld [vmem:[#allocation2 + $0x8] sm:$0xff] (!%p590_p10)  ;;  %v373_v33 = vld [vmem:[#allocation3] sm:$0xff] (!%p590_p10) }
  0x67   : > { %610 = vmatprep.subr.bf16.mxu0 (!%p590_p10), %v911_v3  ;;  %724 = vset.pattern.permute.xlu0 (!%p590_p10), %v913_v13  ;;  %v374_v37 = vld [vmem:[#allocation3 + $0x8] sm:$0xff] (!%p590_p10) }
  0x6a   : > { %611 = vmatpush3.bf16.msra.mxu0 (!%p590_p10), %v726_v4 }
  0x6d   : > { %613 = vmatmul.mubr.msk.bf16.vlgmr.msra.gmra.mrb[0].mxu0 %vm316_vm2, %v727_v5 }
 0x140   : > { %v354_v7 = vpop.f32.mrb[0].mxu0 }
 0x141   : > { %v355_v8 = vadd.f32 %v591_v6, %v354_v7  ;;  %v614_v9 = vpop.f32.mrb[1].mxu0 }
 0x142   : > { %v357_v10 = vpop.f32.mrb[2].mxu0 }
 0x143   : > { %363 = vst [vmem:[%s362_s8] sm:$0xff] %v355_v8  ;;  %v358_v11 = vadd.f32 %v591_v6, %v357_v10  ;;  %367 = vmax.xlane.f32.xlu0 %v355_v8  ;;  %v615_v12 = vpop.f32.mrb[3].mxu0 }
 0x145   : > { %364 = vst [vmem:[%s362_s8 + $0x8] sm:$0xff] %v358_v11 }
 0x147   : > { %369 = vmax.xlane.f32.xlu0 %v358_v11 }
 0x1d0   : > { %v368_v15 = vpop.xlane.xlu0 %367 }
 0x1d1   : > { %v371_v16 = vmax.f32 %v365_v14, %v368_v15 }
 0x1d3   : > { %v375_v18 = vsub.f32 %v365_v14, %v371_v16  ;;  %408 = vst.msk [vmem:[#allocation2] sm:$0xff] %vm405_vm3, %v371_v16  ;;  %385 = vperm.xlu1 %723, %v371_v16  }
 0x1d4   : > { %v370_v19 = vpop.xlane.xlu0 %369 }
 0x1d5   : > { %v372_v20 = vmax.f32 %v366_v17, %v370_v19  ;;  %v377_v30 = vmul.f32 1.442695, %v375_v18 }
 0x1d7   : > { %v376_v21 = vsub.f32 %v366_v17, %v372_v20  ;;  %409 = vst.msk [vmem:[#allocation2 + $0x8] sm:$0xff] %vm405_vm3, %v372_v20  ;;  %390 = vperm.xlu1 %723, %v372_v20  }
 0x1d9   : > { %v379_v31 = vmul.f32 1.442695, %v376_v21 }
 0x252   : > { %v386_v22 = vpop.permute.xlu1 %385 }
 0x253   : > { %v393_v23 = vsub.f32 %v355_v8, %v386_v22 }
 0x255   : > { %v395_v24 = vmul.f32 1.442695, %v393_v23 }
 0x256   : > { %v391_v25 = vpop.permute.xlu1 %390 }
 0x257   : > { %728 = vpow2.f32 %v395_v24  ;;  %v394_v26 = vsub.f32 %v358_v11, %v391_v25 }
 0x259   : > { %v397_v27 = vmul.f32 1.442695, %v394_v26 }
 0x25b   : > { %730 = vpow2.f32 %v397_v27 }
 0x25c   : > { %732 = vpow2.f32 %v377_v30 }
 0x25d   : > { %734 = vpow2.f32 %v379_v31 }
 0x261   : > { %v729_v28 = vpop.eup %728 }
 0x262   : > { %399 = vadd.xlane.f32.xlu0 %v729_v28 }
 0x265   : > { %v731_v29 = vpop.eup %730 }
 0x266   : > { %401 = vadd.xlane.f32.xlu1 %v731_v29  ;;  %v733_v32 = vpop.eup %732 }
 0x267   : > { %v381_v34 = vmul.f32 %v733_v32, %v373_v33  ;;  %v735_v35 = vpop.eup %734 }
 0x268   : > { %v382_v39 = vmul.f32 %v735_v35, %v374_v37 }
 0x2ef   : > { %v400_v36 = vpop.xlane.xlu0 %399 }
 0x2f0   : > { %v403_v38 = vadd.f32 %v400_v36, %v381_v34 }
 0x2f2   : > { %406 = vst.msk [vmem:[#allocation3] sm:$0xff] %vm405_vm3, %v403_v38 }
 0x2f3   : > { %v402_v40 = vpop.xlane.xlu1 %401 }
 0x2f4   : > { %v404_v41 = vadd.f32 %v402_v40, %v382_v39 }
 0x2f6   : > { %407 = vst.msk [vmem:[#allocation3 + $0x8] sm:$0xff] %vm405_vm3, %v404_v41 }
 0x2f7 PF: > { %p597_p12 = scmp.lt.s32.totalorder %s895_s16, 1 }
 0x2f8   : > { %v914_v43 = vmov (!%p597_p12), 0   ;;  %v414_v46 = vld [vmem:[#allocation2] sm:$0xff] (!%p597_p12)  ;;  %v415_v49 = vld [vmem:[#allocation2 + $0x8] sm:$0xff] (!%p597_p12)  ;;  %s598_s9 = sadd.s32 (!%p597_p12), 4294967295, %s895_s16 }
 0x2f9   : > { %413 = sbr.rel (%p597_p12) target bundleno = 912 (0x390), region = 52  ;;  %v416_v42 = vld [vmem:[#allocation3] sm:$0xff] (!%p597_p12)  ;;  %736 = vset.pattern.permute.xlu0 (!%p597_p12), %v914_v43  ;;  %p425_p13 = scmp.gt.s32.totalorder (!%p597_p12), %s598_s9, 0 }
 0x2fa   : > { %737 = vlog2.f32 (!%p597_p12), %v416_v42 }
 0x2fd   : > { %v417_v44 = vld [vmem:[#allocation3 + $0x8] sm:$0xff] (!%p597_p12) }
 0x2fe   : > { %739 = vlog2.f32 (!%p597_p12), %v417_v44 }
 0x300   : > { %s1182_s9 = smov (!%p425_p13, %s598_s9), 0 }
 0x301   : > { %s599_s10 = sshll.u32 %s1182_s9, 4 }
 0x302   : > { %s428_s19 = scalar_lea.vmem [#allocation4], %s599_s10 }
 0x303   : > { %v429_v53 = vld [vmem:[%s428_s19] sm:$0xff]  ;;  %v430_v56 = vld [vmem:[%s428_s19 + $0x8] sm:$0xff] }
 0x304   : > { %v738_v45 = vpop.eup %737 }
 0x305   : > { %v419_v48 = vmul.f32 0.6931472, %v738_v45 }
 0x307   : > { %v422_v51 = vadd.f32 %v419_v48, %v414_v46 }
 0x308   : > { %v740_v47 = vpop.eup %739 }
 0x309   : > { %v421_v50 = vmul.f32 0.6931472, %v740_v47  ;;  %433 = vperm.xlu0 %736, %v422_v51  }
 0x30b   : > { %v423_v52 = vadd.f32 %v421_v50, %v415_v49 }
 0x30d   : > { %438 = vperm.xlu0 %736, %v423_v52  }
 0x388   : > { %v434_v54 = vpop.permute.xlu0 %433 }
 0x389   : > { %v441_v55 = vsub.f32 %v429_v53, %v434_v54 }
 0x38b   : > { %443 = vst [vmem:[%s1077_s7] sm:$0xff] %v441_v55 }
 0x38c   : > { %v439_v57 = vpop.permute.xlu0 %438 }
 0x38d   : > { %v442_v58 = vsub.f32 %v430_v56, %v439_v57 }
 0x38f   : > { %444 = vst [vmem:[%s1077_s7 + $0x8] sm:$0xff] %v442_v58 }
 0x390 PF: > { %s601_s20 = sadd.s32 4294967295, %s895_s16  ;;  %s463_s26 = sshll.u32 %s1077_s7, 4  ;;  %s1092_s26 = int_to_ptr.vmem [resolvable:$true] %s463_s26 }
 0x391   : > { %p454_p2 = scmp.gt.s32.totalorder %s601_s20, 0  ;;  %s1101_s21 = scalar_lea.sflag [#allocation7], %s255_s25 }
 0x392   : > { %s799_s11 = scalar_lea.vmem %s1092_s26, 256  ;;  %p1170_p3 = scmp.ne.s32.totalorder %s1161_s23, 0 }
 0x393   : > { %s1184_s20 = smov (!%p454_p2, %s601_s20), 0  ;;  %p800_p1 = scmp.ne.s32.totalorder %s1092_s26, %s799_s11 }
 0x394   : > { %s602_s28 = sshll.u32 %s1184_s20, 7  ;;  %s915_s16 = smov [#allocation10]  }
 0x395   : > { %s1097_s6 = scalar_lea.hbm %s1152_s3, %s602_s28  ;;  %p801_p7 = pnand %p800_p1, %p1170_p3 }
 0x396   : > { %s803_s14 = sshll.u32 %s915_s16, 4  ;;  %s804_s14 = int_to_ptr.vmem [resolvable:$false] %s803_s14 }
 0x397   : > { %p802_p11 = pneg %p801_p7  ;;  %s805_s30 = scalar_lea.vmem %s804_s14, 512 }
 0x398   : > { %p806_p4 = scmp.lt.s32.totalorder %s1092_s26, %s804_s14  ;;  %p807_p5 = scmp.lt.s32.totalorder %s805_s30, %s799_s11 }
 0x39a   : > { %p808_p0 = por %p807_p5, %p806_p4 }
 0x39c   : > { %p809_p9 = pnand %p808_p0, %p802_p11 }
 0x39e   : > { %812 = shalt.err (!%p809_p9)
}
 0x39f   : > { %s813_s25 = scalar_lea.hbm %s1097_s6, 256  ;;  %s817_s22 = scalar_lea.hbm %s1152_s3, 256 }
 0x3a0   : > { %p814_p6 = scmp.ne.s32.totalorder %s1097_s6, %s813_s25  ;;  %p818_p12 = scmp.lt.u32.totalorder %s1097_s6, %s1152_s3 }
 0x3a1   : > { %p819_p13 = scmp.lt.u32.totalorder %s817_s22, %s813_s25  ;;  %p821_p1 = scmp.lt.u32.totalorder %s813_s25, %s1097_s6 }
 0x3a2   : > { %p815_p8 = pnand %p814_p6, %p1170_p3 }
 0x3a3   : > { %p820_p2 = por %p819_p13, %p818_p12 }
 0x3a4   : > { %p816_p10 = pneg %p815_p8 }
 0x3a5   : > { %p822_p7 = por %p821_p1, %p820_p2 }
 0x3a7   : > { %p823_p11 = pnand %p822_p7, %p816_p10 }
 0x3a9   : > { %826 = shalt.err (!%p823_p11)
}
 0x3aa   : > { %s916_s10 = smov 128   ;;  %s917_s19 = smov 8  }
 0x3ab   : > { %622 = dma.vmem_to_hbm [thread:$0]  (%p1170_p3), %s1092_s26, 256, %s1097_s6, %s1101_s21, %s916_s10, %s916_s10, %s917_s19  }
 0x3ac PF: > { %s478_s20 = sand.u32 1, %s879_s12   ;;  %p1171_p4 = scmp.ne.s32.totalorder %s1162_s24, 0 }
 0x3ad   : > { %p1172_p5 = scmp.ge.s32.totalorder %s903_s18, 2  ;;  %s479_s28 = scalar_lea.sflag [#allocation7], %s478_s20 }
 0x3af   : > { %p633_p0 = pnand %p1172_p5, %p1171_p4 }
 0x3b1   : > { %872 = dma.done.wait (!%p633_p0), %s479_s28, 256  }
 0x3b2   : > { %874 = vsyncadd (!%p633_p0), %s479_s28, 4294967040  ;;  %s20_s18 = sadd.s32 1, %s903_s18   ;;  %s1173_s12 = smov %s883_s13 }
 0x3b3   : > { %p17_p9 = scmp.ge.s32.totalorder %s20_s18, 4   ;;  %s1134_s13 = smov 0  }
 0x3b4   : > { %s1174_s14 = smov %s891_s15  ;;  %s1139_s15 = smov 0  }
 0x3b5   : > { %s1175_s16 = smov %s899_s17  ;;  %s1176_s17 = smov %s1178_s29 }
 0x3b6   :  { %19 = sbr.rel (!%p17_p9) target bundleno = 8 (0x8), region = 100 }
 0x3bd   :  { %484 = vsyncpa [#allocation6], 1 }
 0x3be   :  { %486 = vsyncpa [#allocation6 + $0x1], 1 }
 0x3bf   :  { %487 = vsyncpa [#allocation9], 1 }
 0x3c0   :  { %489 = vsyncpa [#allocation9 + $0x1], 1 }
 0x3c1   :  { %490 = vsyncpa [#allocation7], 1 }
 0x3c2   :  { %492 = vsyncpa [#allocation7 + $0x1], 1 }

</bundles_post_ra>
